<compile_context>
chip_gen: v7x
topology: tpu7x:2x2x1
jax: 0.10.0
libtpu: 0.0.40
codegen_flags: <defaults>
</compile_context>

<pallas_src>
import jax
import jax.numpy as jnp
from jax.experimental import pallas as pl
from jax.experimental.pallas import tpu as pltpu

KERNEL_SIZES = (3, 4, 5)


def _round_up(x, m):
    return ((x + m - 1) // m) * m


def cnn_forward(tokens, params, compute_dtype=jnp.bfloat16):
    """Forward pass of CNNnet (eval mode).  tokens: (B, L) int32."""
    V, E = params["embedding"].shape
    B, L = tokens.shape
    K = params[f"conv{KERNEL_SIZES[0]}_w"].shape[-1]          # kernel_num
    C = params["fc_w"].shape[-1]                              # num_classes
    KS_MAX = max(KERNEL_SIZES)                                # requires L >= KS_MAX

    Lp = _round_up(L, 8)                         # sublane-aligned sequence length
    Fp = _round_up(len(KERNEL_SIZES) * K, 128)   # fused conv channels, lane-dense
    Cp = _round_up(C, 128)                       # lane-dense output columns
    Vp = _round_up(V + 1, 128)                   # +1 zero row used as pad token

    # Batch tile: multiple of 8; one grid step unless we are on a 2-TensorCore
    # chip (v7x) with a batch big enough that each core still gets TB >= 8.
    kind = jax.devices()[0].device_kind.lower()
    n_cores = 2 if "7" in kind else 1
    n_steps = n_cores if (n_cores > 1 and B >= 16) else 1
    TB = min(256, _round_up(pl.cdiv(B, n_steps), 8))
    Bp = _round_up(B, TB)
    grid = Bp // TB
    TBLp = TB * Lp
    TBLp_ext = TBLp + 8                          # zeroed tail for shifted tap reads

    # ---------------- parameter / input prep (wrapper-side, cheap) -----------
    pad_id = V                                           # maps to a zero table row
    tok_p = jnp.full((Bp, Lp), pad_id, jnp.int32)
    tok_p = tok_p.at[:B, :L].set(tokens.astype(jnp.int32))
    tok_p = tok_p.reshape(Bp * Lp, 1)                    # 2-D: seq*batch on sublanes

    table = jnp.zeros((Vp, E), jnp.float32).at[:V].set(params["embedding"])
    table = table.astype(compute_dtype)
    # TODO(synk): for realistic vocabularies (30k+) the one-hot matmul exceeds
    # VMEM; switch to a DMA gather (table in pl.ANY + scalar-prefetched ids).

    # per-tap conv weights (KS_MAX, E, Fp); taps >= ks are zero for branch ks.
    wc = jnp.zeros((KS_MAX, E, Fp), jnp.float32)
    bc = jnp.zeros((1, Fp), jnp.float32)
    for i, ks in enumerate(KERNEL_SIZES):
        w = params[f"conv{ks}_w"]                        # (ks, E, K), tap-major
        wc = wc.at[:ks, :, i * K:(i + 1) * K].set(w)
        bc = bc.at[:, i * K:(i + 1) * K].set(params[f"conv{ks}_b"])
    wc = wc.astype(compute_dtype)

    # constant position-validity mask (1.0 valid / 0.0 invalid), hoisted here.
    mask = jnp.zeros((Lp, Fp), jnp.float32)
    pos = jnp.arange(Lp)
    for i, ks in enumerate(KERNEL_SIZES):
        valid = (pos <= (L - ks)).astype(jnp.float32)
        mask = mask.at[:, i * K:(i + 1) * K].set(
            jnp.broadcast_to(valid[:, None], (Lp, K)))

    wfc = jnp.zeros((Fp, Cp), jnp.float32)
    wfc = wfc.at[:len(KERNEL_SIZES) * K, :C].set(params["fc_w"]).astype(compute_dtype)
    bfc = jnp.zeros((1, Cp), jnp.float32).at[:, :C].set(params["fc_b"])

    # ---------------- the kernel ---------------------------------------------
    def kernel(tok_ref, table_ref, wc_ref, bc_ref, mask_ref, wfc_ref, bfc_ref,
               o_ref, x_scr):
        # 1) embedding lookup: one-hot (TB*Lp, Vp) @ table (Vp, E) on the MXU.
        vids = jax.lax.broadcasted_iota(jnp.int32, (TBLp, Vp), 1)
        onehot = (vids == tok_ref[...]).astype(compute_dtype)      # (TBLp, Vp)
        x = jnp.dot(onehot, table_ref[...],
                    preferred_element_type=jnp.float32)            # (TBLp, E) f32
        x_scr[0:TBLp, :] = x
        x_scr[TBLp:TBLp_ext, :] = jnp.zeros((TBLp_ext - TBLp, E), jnp.float32)

        # 2) conv as KS_MAX per-tap matmuls accumulated in f32.  Shifted rows
        #    that cross a batch boundary / the zero tail only ever land on
        #    positions that are masked out in step 3.
        acc = jnp.zeros((TBLp, Fp), jnp.float32)
        for d in range(KS_MAX):
            xd = x_scr[d:d + TBLp, :].astype(compute_dtype)
            acc = acc + jnp.dot(xd, wc_ref[d],
                                preferred_element_type=jnp.float32)
        conv = jnp.maximum(acc + bc_ref[...], 0.0)                 # (TBLp, Fp)

        # 3) mask out-of-range positions (post-ReLU values are >= 0, so zeroing
        #    is equivalent to -inf), then max-pool over the sequence.
        conv = conv.reshape(TB, Lp, Fp) * mask_ref[...][None]      # layout no-op
        feat = jnp.max(conv, axis=1)                               # (TB, Fp)

        # 4) concat (implicit in channel layout) + fc1; dropout = identity.
        out = jnp.dot(feat.astype(compute_dtype), wfc_ref[...],
                      preferred_element_type=jnp.float32) + bfc_ref[...]
        o_ref[...] = out                                           # (TB, Cp) f32

    def const(shape):
        return pl.BlockSpec(shape, lambda i: (0,) * len(shape))

    itemsize = jnp.dtype(compute_dtype).itemsize
    flops = 2 * grid * (TBLp * Vp * E + KS_MAX * TBLp * E * Fp + TB * Fp * Cp)
    bytes_accessed = (Bp * Lp * 4 + Vp * E * itemsize + KS_MAX * E * Fp * itemsize
                      + Fp * 4 + Lp * Fp * 4 + Fp * Cp * itemsize + Cp * 4
                      + Bp * Cp * 4)

    out = pl.pallas_call(
        kernel,
        out_shape=jax.ShapeDtypeStruct((Bp, Cp), jnp.float32),
        grid_spec=pltpu.PrefetchScalarGridSpec(
            num_scalar_prefetch=0,
            grid=(grid,),
            in_specs=[
                pl.BlockSpec((TBLp, 1), lambda i: (i, 0)),    # token tile
                const((Vp, E)),                               # embedding table
                const((KS_MAX, E, Fp)), const((1, Fp)),       # per-tap conv w / b
                const((Lp, Fp)),                              # validity mask
                const((Fp, Cp)), const((1, Cp)),              # padded fc w / b
            ],
            out_specs=pl.BlockSpec((TB, Cp), lambda i: (i, 0)),
            scratch_shapes=[pltpu.VMEM((TBLp_ext, E), jnp.float32)],
        ),
        compiler_params=pltpu.CompilerParams(
            dimension_semantics=("parallel",)),
        cost_estimate=pl.CostEstimate(
            flops=int(flops), transcendentals=0,
            bytes_accessed=int(bytes_accessed)),
    )(tok_p, table, wc, bc, mask, wfc, bfc)

    return out[:B, :C]


def ref_forward(tokens, params):
    """Pure-JAX f32 reference replicating the PyTorch forward (eval mode)."""
    emb = jnp.take(params["embedding"], tokens, axis=0).astype(jnp.float32)
    L = emb.shape[1]
    feats = []
    for ks in KERNEL_SIZES:
        w = params[f"conv{ks}_w"]
        b = params[f"conv{ks}_b"]
        n_out = L - ks + 1
        conv = sum(jnp.einsum("ble,ek->blk", emb[:, d:d + n_out, :], w[d])
                   for d in range(ks)) + b
        conv = jnp.maximum(conv, 0.0)
        feats.append(jnp.max(conv, axis=1))
    feat = jnp.concatenate(feats, axis=-1)
    return feat @ params["fc_w"] + params["fc_b"]


def init_params(key, vocab, emb_dim, num_classes, kernel_num):
    keys = jax.random.split(key, 9)
    s = 0.1
    params = {
        "embedding": s * jax.random.normal(keys[0], (vocab, emb_dim), jnp.float32),
        "fc_w": s * jax.random.normal(keys[1], (len(KERNEL_SIZES) * kernel_num,
                                                num_classes), jnp.float32),
        "fc_b": s * jax.random.normal(keys[2], (1, num_classes), jnp.float32),
    }
    for i, ks in enumerate(KERNEL_SIZES):
        params[f"conv{ks}_w"] = s * jax.random.normal(
            keys[3 + 2 * i], (ks, emb_dim, kernel_num), jnp.float32)
        params[f"conv{ks}_b"] = s * jax.random.normal(
            keys[4 + 2 * i], (1, kernel_num), jnp.float32)
    return params


if __name__ == "__main__":
    vocab_size = 50        # input_size
    embedding_dim = 32
    num_classes = 4
    kernel_num = 16
    seq_len = 16
    batch = 2

    root = jax.random.PRNGKey(0)
    pkey, tkey = jax.random.split(root)
    params = init_params(pkey, vocab_size, embedding_dim, num_classes, kernel_num)
    tokens = jax.random.randint(tkey, (batch, seq_len), 0, vocab_size, dtype=jnp.int32)

    ref = ref_forward(tokens, params)

    # Exact check with f32 compute.
    out_f32 = jax.block_until_ready(
        cnn_forward(tokens, params, compute_dtype=jnp.float32))
    assert out_f32.shape == (batch, num_classes), out_f32.shape
    assert jnp.allclose(out_f32, ref, atol=1e-4, rtol=1e-4), (out_f32, ref)

    # Fast path: bf16 MXU operands (native on all TPU generations), f32 accum.
    out = jax.block_until_ready(
        cnn_forward(tokens, params, compute_dtype=jnp.bfloat16))
    assert out.shape == (batch, num_classes), out.shape
    assert jnp.allclose(out, ref, atol=5e-2, rtol=5e-2), (out, ref)

    print("KERNEL_OK")
</pallas_src>

<mosaic_0001>
module attributes {stable_mosaic.version = 11 : i64} {
  func.func @kernel(%arg0: i32, %arg1: memref<128x1xi32, #tpu.memory_space<vmem>>, %arg2: memref<128x32xf32, #tpu.memory_space<vmem>>, %arg3: memref<5x32x128xf32, #tpu.memory_space<vmem>>, %arg4: memref<1x128xf32, #tpu.memory_space<vmem>>, %arg5: memref<16x128xf32, #tpu.memory_space<vmem>>, %arg6: memref<128x128xf32, #tpu.memory_space<vmem>>, %arg7: memref<1x128xf32, #tpu.memory_space<vmem>>, %arg8: memref<8x128xf32, #tpu.memory_space<vmem>>, %arg9: memref<136x32xf32, #tpu.memory_space<vmem>>) attributes {dimension_semantics = [#tpu.dimension_semantics<parallel>], iteration_bounds = array<i64: 1>, scalar_prefetch = 0 : i64, scratch_operands = 1 : i64, tpu.core_type = #tpu.core_type<tc>, window_params = [{transform_indices = @transform_0, window_bounds = array<i64: 128, 1>}, {pipeline_mode = #tpu.pipeline_mode<synchronous>, transform_indices = @transform_1, window_bounds = array<i64: 128, 32>}, {pipeline_mode = #tpu.pipeline_mode<synchronous>, transform_indices = @transform_2, window_bounds = array<i64: 5, 32, 128>}, {pipeline_mode = #tpu.pipeline_mode<synchronous>, transform_indices = @transform_3, window_bounds = array<i64: 1, 128>}, {pipeline_mode = #tpu.pipeline_mode<synchronous>, transform_indices = @transform_4, window_bounds = array<i64: 16, 128>}, {pipeline_mode = #tpu.pipeline_mode<synchronous>, transform_indices = @transform_5, window_bounds = array<i64: 128, 128>}, {pipeline_mode = #tpu.pipeline_mode<synchronous>, transform_indices = @transform_6, window_bounds = array<i64: 1, 128>}, {transform_indices = @transform_7, window_bounds = array<i64: 8, 128>}]} {
    %0 = tpu.iota {dimensions = array<i32: 1>} : vector<128x128xi32>
    %c0 = arith.constant 0 : index
    %c0_0 = arith.constant 0 : index
    %1 = vector.load %arg1[%c0, %c0_0] : memref<128x1xi32, #tpu.memory_space<vmem>>, vector<128x1xi32>
    %2 = vector.broadcast %1 : vector<128x1xi32> to vector<128x128xi32>
    %3 = arith.cmpi eq, %0, %2 : vector<128x128xi32>
    %4 = arith.extui %3 : vector<128x128xi1> to vector<128x128xi32>
    %5 = arith.sitofp %4 : vector<128x128xi32> to vector<128x128xf32>
    %c0_1 = arith.constant 0 : index
    %c0_2 = arith.constant 0 : index
    %6 = vector.load %arg2[%c0_1, %c0_2] : memref<128x32xf32, #tpu.memory_space<vmem>>, vector<128x32xf32>
    %cst = arith.constant dense<0.000000e+00> : vector<128x32xf32>
    %7 = tpu.matmul %5, %6, %cst {dimension_numbers = #tpu.dot_dimension_numbers<[1], [0], [0], [1], [0, 0, 1, 1], [], []>} : vector<128x128xf32>, vector<128x32xf32>, vector<128x32xf32> -> vector<128x32xf32>
    %c0_3 = arith.constant 0 : index
    %c0_4 = arith.constant 0 : index
    %8 = vector.load %arg9[%c0_3, %c0_4] : memref<136x32xf32, #tpu.memory_space<vmem>>, vector<128x32xf32>
    tpu.vector_store %arg9[%c0_3, %c0_4], %7 {strides = array<i32>} : memref<136x32xf32, #tpu.memory_space<vmem>>, vector<128x32xf32>,
    %cst_5 = arith.constant 0.000000e+00 : f32
    %9 = vector.broadcast %cst_5 : f32 to vector<8x32xf32>
    %c128 = arith.constant 128 : index
    %c0_6 = arith.constant 0 : index
    %10 = vector.load %arg9[%c128, %c0_6] : memref<136x32xf32, #tpu.memory_space<vmem>>, vector<8x32xf32>
    tpu.vector_store %arg9[%c128, %c0_6], %9 {strides = array<i32>} : memref<136x32xf32, #tpu.memory_space<vmem>>, vector<8x32xf32>,
    %cst_7 = arith.constant 0.000000e+00 : f32
    %11 = vector.broadcast %cst_7 : f32 to vector<128x128xf32>
    %c0_8 = arith.constant 0 : index
    %c0_9 = arith.constant 0 : index
    %12 = vector.load %arg9[%c0_8, %c0_9] : memref<136x32xf32, #tpu.memory_space<vmem>>, vector<128x32xf32>
    %c0_10 = arith.constant 0 : index
    %c0_11 = arith.constant 0 : index
    %c0_12 = arith.constant 0 : index
    %13 = vector.load %arg3[%c0_10, %c0_11, %c0_12] : memref<5x32x128xf32, #tpu.memory_space<vmem>>, vector<1x32x128xf32>
    %14 = vector.shape_cast %13 : vector<1x32x128xf32> to vector<32x128xf32>
    %cst_13 = arith.constant dense<0.000000e+00> : vector<128x128xf32>
    %15 = tpu.matmul %12, %14, %cst_13 {dimension_numbers = #tpu.dot_dimension_numbers<[1], [0], [0], [1], [0, 0, 1, 1], [], []>} : vector<128x32xf32>, vector<32x128xf32>, vector<128x128xf32> -> vector<128x128xf32>
    %16 = arith.addf %11, %15 : vector<128x128xf32>
    %c1 = arith.constant 1 : index
    %c0_14 = arith.constant 0 : index
    %17 = vector.load %arg9[%c1, %c0_14] : memref<136x32xf32, #tpu.memory_space<vmem>>, vector<128x32xf32>
    %c1_15 = arith.constant 1 : index
    %c0_16 = arith.constant 0 : index
    %c0_17 = arith.constant 0 : index
    %18 = vector.load %arg3[%c1_15, %c0_16, %c0_17] : memref<5x32x128xf32, #tpu.memory_space<vmem>>, vector<1x32x128xf32>
    %19 = vector.shape_cast %18 : vector<1x32x128xf32> to vector<32x128xf32>
    %cst_18 = arith.constant dense<0.000000e+00> : vector<128x128xf32>
    %20 = tpu.matmul %17, %19, %cst_18 {dimension_numbers = #tpu.dot_dimension_numbers<[1], [0], [0], [1], [0, 0, 1, 1], [], []>} : vector<128x32xf32>, vector<32x128xf32>, vector<128x128xf32> -> vector<128x128xf32>
    %21 = arith.addf %16, %20 : vector<128x128xf32>
    %c2 = arith.constant 2 : index
    %c0_19 = arith.constant 0 : index
    %22 = vector.load %arg9[%c2, %c0_19] : memref<136x32xf32, #tpu.memory_space<vmem>>, vector<128x32xf32>
    %c2_20 = arith.constant 2 : index
    %c0_21 = arith.constant 0 : index
    %c0_22 = arith.constant 0 : index
    %23 = vector.load %arg3[%c2_20, %c0_21, %c0_22] : memref<5x32x128xf32, #tpu.memory_space<vmem>>, vector<1x32x128xf32>
    %24 = vector.shape_cast %23 : vector<1x32x128xf32> to vector<32x128xf32>
    %cst_23 = arith.constant dense<0.000000e+00> : vector<128x128xf32>
    %25 = tpu.matmul %22, %24, %cst_23 {dimension_numbers = #tpu.dot_dimension_numbers<[1], [0], [0], [1], [0, 0, 1, 1], [], []>} : vector<128x32xf32>, vector<32x128xf32>, vector<128x128xf32> -> vector<128x128xf32>
    %26 = arith.addf %21, %25 : vector<128x128xf32>
    %c3 = arith.constant 3 : index
    %c0_24 = arith.constant 0 : index
    %27 = vector.load %arg9[%c3, %c0_24] : memref<136x32xf32, #tpu.memory_space<vmem>>, vector<128x32xf32>
    %c3_25 = arith.constant 3 : index
    %c0_26 = arith.constant 0 : index
    %c0_27 = arith.constant 0 : index
    %28 = vector.load %arg3[%c3_25, %c0_26, %c0_27] : memref<5x32x128xf32, #tpu.memory_space<vmem>>, vector<1x32x128xf32>
    %29 = vector.shape_cast %28 : vector<1x32x128xf32> to vector<32x128xf32>
    %cst_28 = arith.constant dense<0.000000e+00> : vector<128x128xf32>
    %30 = tpu.matmul %27, %29, %cst_28 {dimension_numbers = #tpu.dot_dimension_numbers<[1], [0], [0], [1], [0, 0, 1, 1], [], []>} : vector<128x32xf32>, vector<32x128xf32>, vector<128x128xf32> -> vector<128x128xf32>
    %31 = arith.addf %26, %30 : vector<128x128xf32>
    %c4 = arith.constant 4 : index
    %c0_29 = arith.constant 0 : index
    %32 = vector.load %arg9[%c4, %c0_29] : memref<136x32xf32, #tpu.memory_space<vmem>>, vector<128x32xf32>
    %c4_30 = arith.constant 4 : index
    %c0_31 = arith.constant 0 : index
    %c0_32 = arith.constant 0 : index
    %33 = vector.load %arg3[%c4_30, %c0_31, %c0_32] : memref<5x32x128xf32, #tpu.memory_space<vmem>>, vector<1x32x128xf32>
    %34 = vector.shape_cast %33 : vector<1x32x128xf32> to vector<32x128xf32>
    %cst_33 = arith.constant dense<0.000000e+00> : vector<128x128xf32>
    %35 = tpu.matmul %32, %34, %cst_33 {dimension_numbers = #tpu.dot_dimension_numbers<[1], [0], [0], [1], [0, 0, 1, 1], [], []>} : vector<128x32xf32>, vector<32x128xf32>, vector<128x128xf32> -> vector<128x128xf32>
    %36 = arith.addf %31, %35 : vector<128x128xf32>
    %c0_34 = arith.constant 0 : index
    %c0_35 = arith.constant 0 : index
    %37 = vector.load %arg4[%c0_34, %c0_35] : memref<1x128xf32, #tpu.memory_space<vmem>>, vector<1x128xf32>
    %38 = vector.broadcast %37 : vector<1x128xf32> to vector<128x128xf32>
    %39 = arith.addf %36, %38 : vector<128x128xf32>
    %cst_36 = arith.constant 0.000000e+00 : f32
    %40 = vector.broadcast %cst_36 : f32 to vector<128x128xf32>
    %41 = arith.maximumf %39, %40 : vector<128x128xf32>
    %42 = vector.shape_cast %41 : vector<128x128xf32> to vector<8x16x128xf32>
    %c0_37 = arith.constant 0 : index
    %c0_38 = arith.constant 0 : index
    %43 = vector.load %arg5[%c0_37, %c0_38] : memref<16x128xf32, #tpu.memory_space<vmem>>, vector<16x128xf32>
    %44 = vector.shape_cast %43 : vector<16x128xf32> to vector<1x16x128xf32>
    %45 = vector.broadcast %44 : vector<1x16x128xf32> to vector<8x16x128xf32>
    %46 = arith.mulf %42, %45 : vector<8x16x128xf32>
    %cst_39 = arith.constant dense<0xFF800000> : vector<8x128xf32>
    %47 = vector.multi_reduction <maximumf>, %46, %cst_39 [1] : vector<8x16x128xf32> to vector<8x128xf32>
    %c0_40 = arith.constant 0 : index
    %c0_41 = arith.constant 0 : index
    %48 = vector.load %arg6[%c0_40, %c0_41] : memref<128x128xf32, #tpu.memory_space<vmem>>, vector<128x128xf32>
    %cst_42 = arith.constant dense<0.000000e+00> : vector<8x128xf32>
    %49 = tpu.matmul %47, %48, %cst_42 {dimension_numbers = #tpu.dot_dimension_numbers<[1], [0], [0], [1], [0, 0, 1, 1], [], []>} : vector<8x128xf32>, vector<128x128xf32>, vector<8x128xf32> -> vector<8x128xf32>
    %c0_43 = arith.constant 0 : index
    %c0_44 = arith.constant 0 : index
    %50 = vector.load %arg7[%c0_43, %c0_44] : memref<1x128xf32, #tpu.memory_space<vmem>>, vector<1x128xf32>
    %51 = vector.broadcast %50 : vector<1x128xf32> to vector<8x128xf32>
    %52 = arith.addf %49, %51 : vector<8x128xf32>
    %c0_45 = arith.constant 0 : index
    %c0_46 = arith.constant 0 : index
    %53 = vector.load %arg8[%c0_45, %c0_46] : memref<8x128xf32, #tpu.memory_space<vmem>>, vector<8x128xf32>
    tpu.vector_store %arg8[%c0_45, %c0_46], %52 {strides = array<i32>} : memref<8x128xf32, #tpu.memory_space<vmem>>, vector<8x128xf32>,
    return
  }
  func.func @transform_0(%arg0: i32) -> (i32, i32) {
    %c0_i32 = arith.constant 0 : i32
    %c0_i32_0 = arith.constant 0 : i32
    return %arg0, %c0_i32 : i32, i32
  }
  func.func @transform_1(%arg0: i32) -> (i32, i32) {
    %c0_i32 = arith.constant 0 : i32
    %c0_i32_0 = arith.constant 0 : i32
    %c0_i32_1 = arith.constant 0 : i32
    return %c0_i32, %c0_i32_0 : i32, i32
  }
  func.func @transform_2(%arg0: i32) -> (i32, i32, i32) {
    %c0_i32 = arith.constant 0 : i32
    %c0_i32_0 = arith.constant 0 : i32
    %c0_i32_1 = arith.constant 0 : i32
    %c0_i32_2 = arith.constant 0 : i32
    return %c0_i32, %c0_i32_0, %c0_i32_1 : i32, i32, i32
  }
  func.func @transform_3(%arg0: i32) -> (i32, i32) {
    %c0_i32 = arith.constant 0 : i32
    %c0_i32_0 = arith.constant 0 : i32
    %c0_i32_1 = arith.constant 0 : i32
    return %c0_i32, %c0_i32_0 : i32, i32
  }
  func.func @transform_4(%arg0: i32) -> (i32, i32) {
    %c0_i32 = arith.constant 0 : i32
    %c0_i32_0 = arith.constant 0 : i32
    %c0_i32_1 = arith.constant 0 : i32
    return %c0_i32, %c0_i32_0 : i32, i32
  }
  func.func @transform_5(%arg0: i32) -> (i32, i32) {
    %c0_i32 = arith.constant 0 : i32
    %c0_i32_0 = arith.constant 0 : i32
    %c0_i32_1 = arith.constant 0 : i32
    return %c0_i32, %c0_i32_0 : i32, i32
  }
  func.func @transform_6(%arg0: i32) -> (i32, i32) {
    %c0_i32 = arith.constant 0 : i32
    %c0_i32_0 = arith.constant 0 : i32
    %c0_i32_1 = arith.constant 0 : i32
    return %c0_i32, %c0_i32_0 : i32, i32
  }
  func.func @transform_7(%arg0: i32) -> (i32, i32) {
    %c0_i32 = arith.constant 0 : i32
    %c0_i32_0 = arith.constant 0 : i32
    return %arg0, %c0_i32 : i32, i32
  }
}

</mosaic_0001>

<bundles_post_ra>
// kernel: tpu_custom_call.1
= control target key start
LH: loop header
LB: loop body
LE: loop exit
PB: predicated region body
PF: predicated region fallthrough
CT: control target
= control target key end

     0   :  { %12 = vsyncpa [#allocation4], 0  ;;  %s2893_s0 = inlined_call_operand.vmem [shape: s32[128,1], index: 0, kind: input, shape index: {}]   ;;  %s2894_s1 = inlined_call_operand.vmem [shape: f32[128,32], index: 1, kind: input, shape index: {}]   ;;  %s2895_s2 = inlined_call_operand.vmem [shape: f32[5,32,128], index: 2, kind: input, shape index: {}]   ;;  %s2896_s3 = inlined_call_operand.hbm [shape: f32[1,128], index: 3, kind: input, shape index: {}]   ;;  %s2897_s4 = inlined_call_operand.vmem [shape: f32[16,128], index: 4, kind: input, shape index: {}]   ;;  %s2898_s5 = inlined_call_operand.vmem [shape: f32[128,128], index: 5, kind: input, shape index: {}]   ;;  %s2899_s6 = inlined_call_operand.vmem [shape: f32[1,128], index: 6, kind: input, shape index: {}]   ;;  %s2900_s7 = inlined_call_operand.hbm [shape: f32[8,128], index: 7, kind: output, shape index: {}]  }
   0x1   :  { %13 = vsyncpa [#allocation5], 0  ;;  %s2445_s24 = smov [#allocation3]   ;;  %s2397_s28 = scalar_lea.hbm %s2896_s3, 16 }
   0x2   :  { %s26_s25 = sshll.u32 %s2445_s24, 4  ;;  %p2398_p0 = scmp.ne.s32.totalorder %s2896_s3, %s2397_s28  ;;  %s27_s25 = int_to_ptr.vmem [resolvable:$true] %s26_s25 }
   0x3   :  { %p2401_p1 = scmp.lt.u32.totalorder %s2397_s28, %s2896_s3 }
   0x5   :  { %p2403_p2 = pnand %p2401_p1, %p2398_p0 }
   0x7   :  { %2406 = shalt.err (!%p2403_p2)
}
   0x8   :  { %s2407_s10 = scalar_lea.vmem %s27_s25, 16  ;;  %s2411_s11 = scalar_lea.vmem %s27_s25, 32 }
   0x9   :  { %p2408_p3 = scmp.ne.s32.totalorder %s27_s25, %s2407_s10  ;;  %p2412_p4 = scmp.lt.s32.totalorder %s27_s25, %s27_s25 }
   0xa   :  { %p2413_p5 = scmp.lt.s32.totalorder %s2411_s11, %s2407_s10 }
   0xc   :  { %p2414_p6 = por %p2413_p5, %p2412_p4 }
   0xe   :  { %p2415_p7 = pnand %p2414_p6, %p2408_p3 }
  0x10   :  { %2418 = shalt.err (!%p2415_p7)
}
  0x11   :  { %29 = dma.hbm_to_vmem [thread:$0]  %s2896_s3, 16, %s27_s25, [#allocation4]  }
  0x12   :  { %2441 = dma.done.wait [#allocation4], 16  }
  0x13   :  { %2442 = vsyncadd [#allocation4], 4294967280  ;;  %v2446_v0 = vmov 0   ;;  %v43_v1 = vld [vmem:[%s2893_s0 + $0x10] sm:$0xff]  ;;  %v41_v2 = vld [vmem:[%s2893_s0] sm:$0xff]  ;;  %v39_v41 = vlaneseq  ;;  %v2447_v45 = vmov 1.0  }
  0x14   :  { %2396 = vset.pattern.permute.xlu1 %v2446_v0  ;;  %2395 = vset.pattern.permute.xlu0 %v2446_v0  ;;  %v44_v3 = vld [vmem:[%s2893_s0 + $0x18] sm:$0xff]  ;;  %v42_v4 = vld [vmem:[%s2893_s0 + $0x8] sm:$0xff]  ;;  %v153_v6 = vld [vmem:[%s2894_s1] sm:$0xff]  ;;  %s2451_s25 = smov [#allocation6]  }
  0x15   :  { %64 = vperm.xlu1 %2396, %v43_v1   ;;  %58 = vperm.xlu0 %2395, %v41_v2   ;;  %v46_v5 = vld [vmem:[%s2893_s0 + $0x28] sm:$0xff]  ;;  %v45_v8 = vld [vmem:[%s2893_s0 + $0x20] sm:$0xff]  ;;  %v155_v10 = vld [vmem:[%s2894_s1 + $0x10] sm:$0xff]  ;;  %v40_v42 = vand.u32 127, %v39_v41  ;;  %s1685_s26 = sshll.u32 %s2451_s25, 4  ;;  %s1686_s26 = int_to_ptr.vmem [resolvable:$true] %s1685_s26 }
  0x16   :  { %v154_v7 = vld [vmem:[%s2894_s1 + $0x8] sm:$0xff]  ;;  %v156_v11 = vld [vmem:[%s2894_s1 + $0x18] sm:$0xff]  ;;  %v157_v13 = vld [vmem:[%s2894_s1 + $0x20] sm:$0xff]  ;;  %s2419_s27 = scalar_lea.vmem %s1686_s26, 128  ;;  %p2424_p9 = scmp.lt.s32.totalorder %s1686_s26, %s1686_s26 }
  0x17   :  { %v2224_v9 = vpack.c.bf16 %v154_v7, %v153_v6  ;;  %v2228_v12 = vpack.c.bf16 %v156_v11, %v155_v10  ;;  %v158_v14 = vld [vmem:[%s2894_s1 + $0x28] sm:$0xff]  ;;  %v48_v15 = vld [vmem:[%s2893_s0 + $0x38] sm:$0xff]  ;;  %v47_v16 = vld [vmem:[%s2893_s0 + $0x30] sm:$0xff]  ;;  %p2420_p8 = scmp.ne.s32.totalorder %s1686_s26, %s2419_s27  ;;  %p2425_p10 = scmp.lt.s32.totalorder %s2419_s27, %s2419_s27 }
  0x18   :  { %v2232_v17 = vpack.c.bf16 %v158_v14, %v157_v13  ;;  %v159_v18 = vld [vmem:[%s2894_s1 + $0x30] sm:$0xff]  ;;  %v160_v19 = vld [vmem:[%s2894_s1 + $0x38] sm:$0xff]  ;;  %v50_v20 = vld [vmem:[%s2893_s0 + $0x48] sm:$0xff] }
  0x19   :  { %67 = vperm.xlu1 %2396, %v44_v3   ;;  %61 = vperm.xlu0 %2395, %v42_v4   ;;  %v49_v21 = vld [vmem:[%s2893_s0 + $0x40] sm:$0xff]  ;;  %v2236_v22 = vpack.c.bf16 %v160_v19, %v159_v18  ;;  %v162_v24 = vld [vmem:[%s2894_s1 + $0x48] sm:$0xff]  ;;  %v52_v25 = vld [vmem:[%s2893_s0 + $0x58] sm:$0xff]  ;;  %p2426_p11 = por %p2425_p10, %p2424_p9 }
  0x1a   :  { %2225 = vmatprep.subr.bf16.mxu0 %v2224_v9  ;;  %v161_v23 = vld [vmem:[%s2894_s1 + $0x40] sm:$0xff]  ;;  %v51_v26 = vld [vmem:[%s2893_s0 + $0x50] sm:$0xff]  ;;  %v164_v29 = vld [vmem:[%s2894_s1 + $0x58] sm:$0xff] }
  0x1b   :  { %2227 = vmatpush3.bf16.msra.mxu0 %v2224_v9  ;;  %v2240_v27 = vpack.c.bf16 %v162_v24, %v161_v23  ;;  %v163_v28 = vld [vmem:[%s2894_s1 + $0x50] sm:$0xff]  ;;  %v54_v30 = vld [vmem:[%s2893_s0 + $0x68] sm:$0xff]  ;;  %v53_v31 = vld [vmem:[%s2893_s0 + $0x60] sm:$0xff]  ;;  %p2427_p12 = pnand %p2426_p11, %p2420_p8 }
  0x1c   :  { %2229 = vmatprep.subr.bf16.mxu0 %v2228_v12  ;;  %v2244_v32 = vpack.c.bf16 %v164_v29, %v163_v28  ;;  %v165_v33 = vld [vmem:[%s2894_s1 + $0x60] sm:$0xff]  ;;  %v166_v34 = vld [vmem:[%s2894_s1 + $0x68] sm:$0xff]  ;;  %v56_v35 = vld [vmem:[%s2893_s0 + $0x78] sm:$0xff] }
  0x1d   :  { %73 = vperm.xlu1 %2396, %v46_v5   ;;  %70 = vperm.xlu0 %2395, %v45_v8   ;;  %v55_v36 = vld [vmem:[%s2893_s0 + $0x70] sm:$0xff]  ;;  %v2248_v37 = vpack.c.bf16 %v166_v34, %v165_v33  ;;  %v168_v39 = vld [vmem:[%s2894_s1 + $0x78] sm:$0xff]  ;;  %v1726_v60 = vld [vmem:[%s2895_s2 + $0x20] sm:$0xff]  ;;  %v2448_v5 = vmov 0.0  }
  0x1e   :  { %v167_v38 = vld [vmem:[%s2894_s1 + $0x70] sm:$0xff]  ;;  %v1727_v61 = vld [vmem:[%s2895_s2 + $0x28] sm:$0xff]  ;;  %v1729_v0 = vld [vmem:[%s2895_s2 + $0x38] sm:$0xff] }
  0x1f   :  { %2231 = vmatpush3.bf16.msra.mxu0 %v2228_v12  ;;  %v2252_v40 = vpack.c.bf16 %v168_v39, %v167_v38  ;;  %v2256_v62 = vpack.c.bf16 %v1727_v61, %v1726_v60  ;;  %v1728_v63 = vld [vmem:[%s2895_s2 + $0x30] sm:$0xff]  ;;  %v348_v2 = vld [vmem:[%s2895_s2] sm:$0xff]  ;;  %v349_v3 = vld [vmem:[%s2895_s2 + $0x8] sm:$0xff] }
  0x20   :  { %2233 = vmatprep.subr.bf16.mxu0 %v2232_v17  ;;  %v2260_v1 = vpack.c.bf16 %v1729_v0, %v1728_v63  ;;  %v2264_v4 = vpack.c.bf16 %v349_v3, %v348_v2  ;;  %v1762_v6 = vld [vmem:[%s2895_s2 + $0x40] sm:$0xff]  ;;  %v1763_v7 = vld [vmem:[%s2895_s2 + $0x48] sm:$0xff] }
  0x21   :  { %79 = vperm.xlu1 %2396, %v48_v15   ;;  %76 = vperm.xlu0 %2395, %v47_v16   ;;  %v2626_v8 = vpack.c.bf16 %v1763_v7, %v1762_v6  ;;  %v350_v16 = vld [vmem:[%s2895_s2 + $0x10] sm:$0xff]  ;;  %v1802_v0 = vld [vmem:[%s2895_s2 + $0x80] sm:$0xff] }
  0x22   :  { %2320 = vmatprep.subr.bf16.mxu1 %v2256_v62 }
  0x23   :  { %2235 = vmatpush3.bf16.msra.mxu0 %v2232_v17  ;;  %2322 = vmatpush3.bf16.msra.mxu1 %v2256_v62  ;;  %v351_v17 = vld [vmem:[%s2895_s2 + $0x18] sm:$0xff] }
  0x24   :  { %2237 = vmatprep.subr.bf16.mxu0 %v2236_v22  ;;  %2321 = vmatprep.subr.bf16.mxu1 %v2260_v1  ;;  %v2268_v19 = vpack.c.bf16 %v351_v17, %v350_v16 }
  0x25   :  { %85 = vperm.xlu1 %2396, %v50_v20   ;;  %82 = vperm.xlu0 %2395, %v49_v21  }
  0x27   :  { %2239 = vmatpush3.bf16.msra.mxu0 %v2236_v22  ;;  %2323 = vmatpush3.bf16.msra.mxu1 %v2260_v1 }
  0x28   :  { %2241 = vmatprep.subr.bf16.mxu0 %v2240_v27  ;;  %2273 = vmatprep.subr.bf16.mxu1 %v2626_v8 }
  0x29   :  { %91 = vperm.xlu1 %2396, %v52_v25   ;;  %88 = vperm.xlu0 %2395, %v51_v26  }
  0x2b   :  { %2243 = vmatpush3.bf16.msra.mxu0 %v2240_v27 }
  0x2c   :  { %2245 = vmatprep.subr.bf16.mxu0 %v2244_v32 }
  0x2d   :  { %97 = vperm.xlu1 %2396, %v54_v30   ;;  %94 = vperm.xlu0 %2395, %v53_v31  }
  0x2f   :  { %2247 = vmatpush3.bf16.msra.mxu0 %v2244_v32 }
  0x30   :  { %2249 = vmatprep.subr.bf16.mxu0 %v2248_v37 }
  0x31   :  { %103 = vperm.xlu1 %2396, %v56_v35   ;;  %100 = vperm.xlu0 %2395, %v55_v36   ;;  %v1764_v36 = vld [vmem:[%s2895_s2 + $0x50] sm:$0xff] }
  0x33   :  { %2251 = vmatpush3.bf16.msra.mxu0 %v2248_v37 }
  0x34   :  { %2253 = vmatprep.subr.bf16.mxu0 %v2252_v40 }
  0x37   :  { %2255 = vmatpush3.bf16.msra.mxu0 %v2252_v40  ;;  %v1765_v40 = vld [vmem:[%s2895_s2 + $0x58] sm:$0xff] }
  0x38   :  { %2257 = vmatprep.subr.bf16.mxu0 %v2256_v62 }
  0x94   :  { %v65_v43 = vpop.permute.xlu1 %64  ;;  %v59_v44 = vpop.permute.xlu0 %58 }
  0x95   :  { %vm105_vm0 = vcmp.eq.s32.totalorder %v40_v42, %v59_v44  ;;  %vm107_vm1 = vcmp.eq.s32.totalorder %v40_v42, %v65_v43 }
  0x96   :  { %2005 = vmatprep.mubr.msk.f32.mxu0 %vm105_vm0, %v2447_v45  ;;  %vm314_vm0 = vcmask 261120  }
  0x97   :  { %331 = vst.msk [vmem:[#allocation2 + $0x80] sm:$0xff] %vm314_vm0, %v2448_v5 }
  0x98   :  { %v68_v46 = vpop.permute.xlu1 %67  ;;  %v62_v47 = vpop.permute.xlu0 %61 }
  0x99   :  { %vm106_vm2 = vcmp.eq.s32.totalorder %v40_v42, %v62_v47  ;;  %vm108_vm3 = vcmp.eq.s32.totalorder %v40_v42, %v68_v46  ;;  %v1782_v46 = vld [vmem:[%s2895_s2 + $0x60] sm:$0xff]  ;;  %v1783_v47 = vld [vmem:[%s2895_s2 + $0x68] sm:$0xff] }
  0x9a   :  { %2006 = vmatmul.mubr.msk.f32.vlgmr.msra.gmra.mrb[0].mxu0 %vm106_vm2, %v2447_v45  ;;  %vm1593_vm2 = vcmask 1041409  }
  0x9b   :  { %2008 = vmatprep.mubr.msk.f32.mxu0 %vm107_vm1, %v2447_v45  ;;  %2259 = vmatpush3.bf16.msra.mxu0 %v2256_v62  ;;  %vm2450_vm1 = vmmov 0  }
  0x9c   :  { %v74_v48 = vpop.permute.xlu1 %73  ;;  %v71_v49 = vpop.permute.xlu0 %70  ;;  %2261 = vmatprep.subr.bf16.mxu0 %v2260_v1 }
  0x9d   :  { %vm109_vm4 = vcmp.eq.s32.totalorder %v40_v42, %v71_v49  ;;  %vm110_vm5 = vcmp.eq.s32.totalorder %v40_v42, %v74_v48 }
  0x9e   :  { %2009 = vmatmul.mubr.msk.f32.gmra.mrb[2].mxu0 %vm108_vm3, %v2447_v45  ;;  %vm1595_vm3 = vcmask 1042434  }
  0x9f   :  { %2011 = vmatprep.mubr.msk.f32.mxu0 %vm109_vm4, %v2447_v45  ;;  %2263 = vmatpush3.bf16.msra.mxu0 %v2260_v1  ;;  %v1803_v1 = vld [vmem:[%s2895_s2 + $0x88] sm:$0xff]  ;;  %vm1597_vm4 = vcmask 1043459  }
  0xa0   :  { %v80_v50 = vpop.permute.xlu1 %79  ;;  %v77_v51 = vpop.permute.xlu0 %76  ;;  %2265 = vmatprep.subr.bf16.mxu0 %v2264_v4  ;;  %v2288_v6 = vpack.c.bf16 %v1803_v1, %v1802_v0  ;;  %v1564_v0 = vld [vmem:[%s2898_s5 + $0x10] sm:$0xff]  ;;  %v1565_v1 = vld [vmem:[%s2898_s5 + $0x18] sm:$0xff] }
  0xa1   :  { %vm111_vm6 = vcmp.eq.s32.totalorder %v40_v42, %v77_v51  ;;  %vm112_vm7 = vcmp.eq.s32.totalorder %v40_v42, %v80_v50 }
  0xa2   :  { %2012 = vmatmul.mubr.msk.f32.gmra.mrb[4].mxu0 %vm110_vm5, %v2447_v45  ;;  %vm1599_vm5 = vcmask 1044484  }
  0xa3   :  { %2014 = vmatprep.mubr.msk.f32.mxu0 %vm111_vm6, %v2447_v45  ;;  %vm1601_vm6 = vcmask 1045509  }
  0xa4   :  { %v86_v52 = vpop.permute.xlu1 %85  ;;  %v83_v53 = vpop.permute.xlu0 %82 }
  0xa5   :  { %vm113_vm8 = vcmp.eq.s32.totalorder %v40_v42, %v83_v53  ;;  %vm114_vm9 = vcmp.eq.s32.totalorder %v40_v42, %v86_v52  ;;  %v2280_v52 = vpack.c.bf16 %v1783_v47, %v1782_v46 }
  0xa6   :  { %2015 = vmatmul.mubr.msk.f32.gmra.mrb[6].mxu0 %vm112_vm7, %v2447_v45  ;;  %vm1603_vm7 = vcmask 1046534  }
  0xa7   :  { %2017 = vmatprep.mubr.msk.f32.mxu0 %vm113_vm8, %v2447_v45  ;;  %vm1605_vm8 = vcmask 1047559  }
  0xa8   :  { %v92_v54 = vpop.permute.xlu1 %91  ;;  %v89_v55 = vpop.permute.xlu0 %88 }
  0xa9   :  { %vm115_vm10 = vcmp.eq.s32.totalorder %v40_v42, %v89_v55  ;;  %vm116_vm11 = vcmp.eq.s32.totalorder %v40_v42, %v92_v54  ;;  %v1784_v54 = vld [vmem:[%s2895_s2 + $0x70] sm:$0xff] }
  0xaa   :  { %2018 = vmatmul.mubr.msk.f32.gmra.mrb[8].mxu0 %vm114_vm9, %v2447_v45 }
  0xab   :  { %2020 = vmatprep.mubr.msk.f32.mxu0 %vm115_vm10, %v2447_v45 }
  0xac   :  { %v98_v56 = vpop.permute.xlu1 %97  ;;  %v95_v57 = vpop.permute.xlu0 %94 }
  0xad   :  { %vm117_vm12 = vcmp.eq.s32.totalorder %v40_v42, %v95_v57  ;;  %vm118_vm13 = vcmp.eq.s32.totalorder %v40_v42, %v98_v56  ;;  %v1785_v57 = vld [vmem:[%s2895_s2 + $0x78] sm:$0xff] }
  0xae   :  { %2021 = vmatmul.mubr.msk.f32.gmra.mrb[10].mxu0 %vm116_vm11, %v2447_v45  ;;  %v2284_v60 = vpack.c.bf16 %v1785_v57, %v1784_v54 }
  0xaf   :  { %2023 = vmatprep.mubr.msk.f32.mxu0 %vm117_vm12, %v2447_v45 }
  0xb0   :  { %v101_v58 = vpop.permute.xlu0 %100  ;;  %v104_v59 = vpop.permute.xlu1 %103 }
  0xb1   :  { %vm119_vm14 = vcmp.eq.s32.totalorder %v40_v42, %v101_v58  ;;  %vm120_vm15 = vcmp.eq.s32.totalorder %v40_v42, %v104_v59  ;;  %v2276_v42 = vpack.c.bf16 %v1765_v40, %v1764_v36 }
  0xb2   :  { %2024 = vmatmul.mubr.msk.f32.gmra.mrb[12].mxu0 %vm118_vm13, %v2447_v45 }
  0xb3   :  { %2026 = vmatprep.mubr.msk.f32.mxu0 %vm119_vm14, %v2447_v45 }
  0xb6   :  { %2027 = vmatmul.mubr.msk.f32.gmra.mrb[14].mxu0 %vm120_vm15, %v2447_v45 }
 0x16d   :  { %v2007_v9 = vpop.f32.mrb[0].mxu0 }
 0x16e   :  { %316 = vst.msk [vmem:[#allocation2 + $0x8] sm:$0xff] %vm314_vm0, %v2007_v9  ;;  %v235_v10 = vpop.f32.mrb[1].mxu0 }
 0x16f   :  { %315 = vst.msk [vmem:[#allocation2] sm:$0xff] %vm314_vm0, %v235_v10 }
 0x171   :  { %v2010_v11 = vpop.f32.mrb[2].mxu0 }
 0x172   :  { %318 = vst.msk [vmem:[#allocation2 + $0x18] sm:$0xff] %vm314_vm0, %v2010_v11  ;;  %v245_v12 = vpop.f32.mrb[3].mxu0 }
 0x173   :  { %317 = vst.msk [vmem:[#allocation2 + $0x10] sm:$0xff] %vm314_vm0, %v245_v12 }
 0x175   :  { %v2013_v13 = vpop.f32.mrb[4].mxu0  ;;  %v333_v44 = vld [vmem:[#allocation2 + $0x8] sm:$0xff] }
 0x176   :  { %320 = vst.msk [vmem:[#allocation2 + $0x28] sm:$0xff] %vm314_vm0, %v2013_v13  ;;  %v255_v14 = vpop.f32.mrb[5].mxu0  ;;  %v352_v15 = vld [vmem:[#allocation2 + $0x1] sm:$0xff] }
 0x177   :  { %319 = vst.msk [vmem:[#allocation2 + $0x20] sm:$0xff] %vm314_vm0, %v255_v14  ;;  %2037 = vmatprep.mubr.msk.f32.mxu0 %vm314_vm0, %v352_v15  ;;  %v332_v41 = vld [vmem:[#allocation2] sm:$0xff] }
 0x178   :  { %v759_v59 = vld [vmem:[#allocation2 + $0x2] sm:$0xff] }
 0x179   :  { %v2016_v18 = vpop.f32.mrb[6].mxu0  ;;  %v335_v50 = vld [vmem:[#allocation2 + $0x18] sm:$0xff] }
 0x17a   :  { %322 = vst.msk [vmem:[#allocation2 + $0x38] sm:$0xff] %vm314_vm0, %v2016_v18  ;;  %v265_v20 = vpop.f32.mrb[7].mxu0  ;;  %v353_v21 = vld [vmem:[#allocation2 + $0x9] sm:$0xff]  ;;  %v354_v22 = vld [vmem:[#allocation2 + $0x11] sm:$0xff] }
 0x17b   :  { %321 = vst.msk [vmem:[#allocation2 + $0x30] sm:$0xff] %vm314_vm0, %v265_v20  ;;  %2038 = vmatmul.mubr.msk.f32.vlgmr.msra.gmra.mrb[16].mxu0 %vm314_vm0, %v353_v21  ;;  %v334_v48 = vld [vmem:[#allocation2 + $0x10] sm:$0xff] }
 0x17c   :  { %2040 = vmatprep.mubr.msk.f32.mxu0 %vm314_vm0, %v354_v22  ;;  %2267 = vmatpush3.bf16.msra.mxu0 %v2264_v4  ;;  %v760_v62 = vld [vmem:[#allocation2 + $0xa] sm:$0xff]  ;;  %v761_v2 = vld [vmem:[#allocation2 + $0x12] sm:$0xff] }
 0x17d   :  { %v2019_v23 = vpop.f32.mrb[8].mxu0  ;;  %2269 = vmatprep.subr.bf16.mxu0 %v2268_v19  ;;  %v337_v56 = vld [vmem:[#allocation2 + $0x28] sm:$0xff]  ;;  %v1221_v46 = vld [vmem:[#allocation2 + $0x14] sm:$0xff] }
 0x17e   :  { %324 = vst.msk [vmem:[#allocation2 + $0x48] sm:$0xff] %vm314_vm0, %v2019_v23  ;;  %v275_v24 = vpop.f32.mrb[9].mxu0  ;;  %v355_v25 = vld [vmem:[#allocation2 + $0x19] sm:$0xff]  ;;  %v356_v26 = vld [vmem:[#allocation2 + $0x21] sm:$0xff] }
 0x17f   :  { %323 = vst.msk [vmem:[#allocation2 + $0x40] sm:$0xff] %vm314_vm0, %v275_v24  ;;  %2041 = vmatmul.mubr.msk.f32.gmra.mrb[18].mxu0 %vm314_vm0, %v355_v25  ;;  %v336_v53 = vld [vmem:[#allocation2 + $0x20] sm:$0xff] }
 0x180   :  { %2043 = vmatprep.mubr.msk.f32.mxu0 %vm314_vm0, %v356_v26  ;;  %2271 = vmatpush3.bf16.msra.mxu0 %v2268_v19  ;;  %v762_v4 = vld [vmem:[#allocation2 + $0x1a] sm:$0xff]  ;;  %v1805_v26 = vld [vmem:[%s2895_s2 + $0x98] sm:$0xff] }
 0x181   :  { %v2022_v27 = vpop.f32.mrb[10].mxu0  ;;  %v339_v61 = vld [vmem:[#allocation2 + $0x38] sm:$0xff]  ;;  %v1804_v25 = vld [vmem:[%s2895_s2 + $0x90] sm:$0xff] }
 0x182   :  { %326 = vst.msk [vmem:[#allocation2 + $0x58] sm:$0xff] %vm314_vm0, %v2022_v27  ;;  %v285_v28 = vpop.f32.mrb[11].mxu0  ;;  %v357_v29 = vld [vmem:[#allocation2 + $0x29] sm:$0xff]  ;;  %v358_v30 = vld [vmem:[#allocation2 + $0x31] sm:$0xff]  ;;  %v1222_v47 = vld [vmem:[#allocation2 + $0x1c] sm:$0xff] }
 0x183   :  { %325 = vst.msk [vmem:[#allocation2 + $0x50] sm:$0xff] %vm314_vm0, %v285_v28  ;;  %2044 = vmatmul.mubr.msk.f32.gmra.mrb[20].mxu0 %vm314_vm0, %v357_v29  ;;  %v338_v58 = vld [vmem:[#allocation2 + $0x30] sm:$0xff]  ;;  %v989_v27 = vld [vmem:[#allocation2 + $0x3] sm:$0xff]  ;;  %v2292_v28 = vpack.c.bf16 %v1805_v26, %v1804_v25 }
 0x184   :  { %2046 = vmatprep.mubr.msk.f32.mxu0 %vm314_vm0, %v358_v30  ;;  %v764_v10 = vld [vmem:[#allocation2 + $0x2a] sm:$0xff]  ;;  %v765_v12 = vld [vmem:[#allocation2 + $0x32] sm:$0xff] }
 0x185   :  { %v2025_v31 = vpop.f32.mrb[12].mxu0  ;;  %v341_v3 = vld [vmem:[#allocation2 + $0x48] sm:$0xff]  ;;  %v991_v30 = vld [vmem:[#allocation2 + $0x13] sm:$0xff] }
 0x186   :  { %328 = vst.msk [vmem:[#allocation2 + $0x68] sm:$0xff] %vm314_vm0, %v2025_v31  ;;  %v295_v32 = vpop.f32.mrb[13].mxu0  ;;  %v359_v33 = vld [vmem:[#allocation2 + $0x39] sm:$0xff]  ;;  %v360_v34 = vld [vmem:[#allocation2 + $0x41] sm:$0xff]  ;;  %v990_v29 = vld [vmem:[#allocation2 + $0xb] sm:$0xff] }
 0x187   :  { %327 = vst.msk [vmem:[#allocation2 + $0x60] sm:$0xff] %vm314_vm0, %v295_v32  ;;  %2047 = vmatmul.mubr.msk.f32.gmra.mrb[22].mxu0 %vm314_vm0, %v359_v33  ;;  %v340_v63 = vld [vmem:[#allocation2 + $0x40] sm:$0xff]  ;;  %v994_v33 = vld [vmem:[#allocation2 + $0x2b] sm:$0xff] }
 0x188   :  { %2049 = vmatprep.mubr.msk.f32.mxu0 %vm314_vm0, %v360_v34  ;;  %v766_v14 = vld [vmem:[#allocation2 + $0x3a] sm:$0xff]  ;;  %v767_v16 = vld [vmem:[#allocation2 + $0x42] sm:$0xff] }
 0x189   :  { %v2028_v35 = vpop.f32.mrb[14].mxu0  ;;  %v343_v9 = vld [vmem:[#allocation2 + $0x58] sm:$0xff]  ;;  %v993_v32 = vld [vmem:[#allocation2 + $0x23] sm:$0xff] }
 0x18a   :  { %330 = vst.msk [vmem:[#allocation2 + $0x78] sm:$0xff] %vm314_vm0, %v2028_v35  ;;  %v305_v37 = vpop.f32.mrb[15].mxu0  ;;  %v361_v38 = vld [vmem:[#allocation2 + $0x49] sm:$0xff]  ;;  %v362_v39 = vld [vmem:[#allocation2 + $0x51] sm:$0xff]  ;;  %v992_v31 = vld [vmem:[#allocation2 + $0x1b] sm:$0xff] }
 0x18b   :  { %329 = vst.msk [vmem:[#allocation2 + $0x70] sm:$0xff] %vm314_vm0, %v305_v37  ;;  %2050 = vmatmul.mubr.msk.f32.gmra.mrb[24].mxu0 %vm314_vm0, %v361_v38  ;;  %2052 = vmatprep.mubr.msk.f32.mxu1 %vm314_vm0, %v362_v39  ;;  %v342_v7 = vld [vmem:[#allocation2 + $0x50] sm:$0xff]  ;;  %v996_v35 = vld [vmem:[#allocation2 + $0x3b] sm:$0xff]  ;;  %v997_v36 = vld [vmem:[#allocation2 + $0x43] sm:$0xff] }
 0x18c   :  { %2069 = vmatprep.mubr.msk.f32.mxu0 %vm314_vm0, %v332_v41  ;;  %v768_v18 = vld [vmem:[#allocation2 + $0x4a] sm:$0xff]  ;;  %v769_v19 = vld [vmem:[#allocation2 + $0x52] sm:$0xff] }
 0x18d   :  { %v345_v13 = vld [vmem:[#allocation2 + $0x68] sm:$0xff]  ;;  %v995_v34 = vld [vmem:[#allocation2 + $0x33] sm:$0xff] }
 0x18e   :  { %v363_v43 = vld [vmem:[#allocation2 + $0x59] sm:$0xff]  ;;  %v364_v45 = vld [vmem:[#allocation2 + $0x61] sm:$0xff]  ;;  %v998_v37 = vld [vmem:[#allocation2 + $0x4b] sm:$0xff] }
 0x18f   :  { %2053 = vmatmul.mubr.msk.f32.vlgmr.msra.gmra.mrb[0].mxu1 %vm314_vm0, %v363_v43  ;;  %2070 = vmatmul.mubr.msk.f32.vlgmr.msra.gmra.mrb[16].mxu0 %vm314_vm0, %v333_v44  ;;  %v344_v11 = vld [vmem:[#allocation2 + $0x60] sm:$0xff]  ;;  %v999_v38 = vld [vmem:[#allocation2 + $0x53] sm:$0xff] }
 0x190   :  { %2275 = vmatpush3.bf16.msra.mxu1 %v2626_v8  ;;  %2055 = vmatprep.mubr.msk.f32.mxu1 %vm314_vm0, %v364_v45  ;;  %v763_v8 = vld [vmem:[#allocation2 + $0x22] sm:$0xff]  ;;  %v770_v20 = vld [vmem:[#allocation2 + $0x5a] sm:$0xff]  ;;  %v1220_v45 = vld [vmem:[#allocation2 + $0xc] sm:$0xff] }
 0x191   :  { %2072 = vmatprep.mubr.msk.f32.mxu0 %vm314_vm0, %v334_v48  ;;  %2277 = vmatprep.subr.bf16.mxu1 %v2276_v42  ;;  %v367_v55 = vld [vmem:[#allocation2 + $0x79] sm:$0xff]  ;;  %v771_v21 = vld [vmem:[#allocation2 + $0x62] sm:$0xff] }
 0x192   :  { %v365_v49 = vld [vmem:[#allocation2 + $0x69] sm:$0xff]  ;;  %v366_v51 = vld [vmem:[#allocation2 + $0x71] sm:$0xff]  ;;  %v774_v24 = vld [vmem:[#allocation2 + $0x7a] sm:$0xff] }
 0x193   :  { %2056 = vmatmul.mubr.msk.f32.gmra.mrb[2].mxu1 %vm314_vm0, %v365_v49  ;;  %2073 = vmatmul.mubr.msk.f32.gmra.mrb[18].mxu0 %vm314_vm0, %v335_v50  ;;  %v346_v15 = vld [vmem:[#allocation2 + $0x70] sm:$0xff]  ;;  %v347_v17 = vld [vmem:[#allocation2 + $0x78] sm:$0xff]  ;;  %v1001_v40 = vld [vmem:[#allocation2 + $0x63] sm:$0xff] }
 0x194   :  { %2058 = vmatprep.mubr.msk.f32.mxu1 %vm314_vm0, %v366_v51  ;;  %2075 = vmatprep.mubr.msk.f32.mxu0 %vm314_vm0, %v336_v53  ;;  %v772_v22 = vld [vmem:[#allocation2 + $0x6a] sm:$0xff]  ;;  %v773_v23 = vld [vmem:[#allocation2 + $0x72] sm:$0xff]  ;;  %v1000_v39 = vld [vmem:[#allocation2 + $0x5b] sm:$0xff] }
 0x195   :  { %2279 = vmatpush3.bf16.msra.mxu1 %v2276_v42  ;;  %v1002_v41 = vld [vmem:[#allocation2 + $0x6b] sm:$0xff]  ;;  %v1003_v42 = vld [vmem:[#allocation2 + $0x73] sm:$0xff]  ;;  %v1004_v43 = vld [vmem:[#allocation2 + $0x7b] sm:$0xff] }
 0x196   :  { %2281 = vmatprep.subr.bf16.mxu1 %v2280_v52  ;;  %v1219_v44 = vld [vmem:[#allocation2 + $0x4] sm:$0xff]  ;;  %v1224_v49 = vld [vmem:[#allocation2 + $0x2c] sm:$0xff]  ;;  %v1225_v50 = vld [vmem:[#allocation2 + $0x34] sm:$0xff] }
 0x197   :  { %2059 = vmatmul.mubr.msk.f32.gmra.mrb[4].mxu1 %vm314_vm0, %v367_v55  ;;  %2076 = vmatmul.mubr.msk.f32.gmra.mrb[20].mxu0 %vm314_vm0, %v337_v56  ;;  %v1223_v48 = vld [vmem:[#allocation2 + $0x24] sm:$0xff]  ;;  %v1226_v51 = vld [vmem:[#allocation2 + $0x3c] sm:$0xff]  ;;  %v1228_v53 = vld [vmem:[#allocation2 + $0x4c] sm:$0xff] }
 0x198   :  { %2078 = vmatprep.mubr.msk.f32.mxu0 %vm314_vm0, %v338_v58  ;;  %2101 = vmatprep.mubr.msk.f32.mxu1 %vm314_vm0, %v759_v59  ;;  %v1229_v54 = vld [vmem:[#allocation2 + $0x54] sm:$0xff]  ;;  %v1230_v55 = vld [vmem:[#allocation2 + $0x5c] sm:$0xff]  ;;  %v1231_v56 = vld [vmem:[#allocation2 + $0x64] sm:$0xff] }
 0x199   :  { %v1232_v57 = vld [vmem:[#allocation2 + $0x6c] sm:$0xff]  ;;  %v1233_v58 = vld [vmem:[#allocation2 + $0x74] sm:$0xff]  ;;  %v1234_v59 = vld [vmem:[#allocation2 + $0x7c] sm:$0xff] }
 0x19b   :  { %2079 = vmatmul.mubr.msk.f32.gmra.mrb[22].mxu0 %vm314_vm0, %v339_v61  ;;  %2102 = vmatmul.mubr.msk.f32.vlgmr.msra.gmra.mrb[6].mxu1 %vm314_vm0, %v760_v62  ;;  %v1563_v61 = vld [vmem:[%s2898_s5 + $0x8] sm:$0xff] }
 0x19c   :  { %2283 = vmatpush3.bf16.msra.mxu1 %v2280_v52  ;;  %2081 = vmatprep.mubr.msk.f32.mxu0 %vm314_vm0, %v340_v63  ;;  %v1227_v52 = vld [vmem:[#allocation2 + $0x44] sm:$0xff]  ;;  %v2449_v63 = vmov 0.0|0.0  }
 0x19d   :  { %2104 = vmatprep.mubr.msk.f32.mxu1 %vm314_vm0, %v761_v2  ;;  %2285 = vmatprep.subr.bf16.mxu1 %v2284_v60  ;;  %v2300_v2 = vpack.c.bf16 %v1565_v1, %v1564_v0 }
 0x19e   :  { %2296 = vmatprep.subr.bf16.mxu0 %v2449_v63 }
 0x19f   :  { %2082 = vmatmul.mubr.msk.f32.gmra.mrb[24].mxu0 %vm314_vm0, %v341_v3  ;;  %2105 = vmatmul.mubr.msk.f32.gmra.mrb[8].mxu1 %vm314_vm0, %v762_v4  ;;  %v1566_v3 = vld [vmem:[%s2898_s5 + $0x20] sm:$0xff]  ;;  %v1567_v4 = vld [vmem:[%s2898_s5 + $0x28] sm:$0xff] }
 0x1a0   :  { %2084 = vmatprep.mubr.msk.f32.mxu0 %vm314_vm0, %v342_v7  ;;  %2107 = vmatprep.mubr.msk.f32.mxu1 %vm314_vm0, %v763_v8  ;;  %v1568_v7 = vld [vmem:[%s2898_s5 + $0x30] sm:$0xff]  ;;  %v1569_v8 = vld [vmem:[%s2898_s5 + $0x38] sm:$0xff] }
 0x1a1   :  { %2287 = vmatpush3.bf16.msra.mxu1 %v2284_v60  ;;  %v1562_v60 = vld [vmem:[%s2898_s5] sm:$0xff] }
 0x1a2   :  { %2289 = vmatprep.subr.bf16.mxu1 %v2288_v6  ;;  %v2297_v62 = vpack.c.bf16 %v1563_v61, %v1562_v60 }
 0x1a3   :  { %2085 = vmatmul.mubr.msk.f32.gmra.mrb[26].mxu0 %vm314_vm0, %v343_v9  ;;  %2108 = vmatmul.mubr.msk.f32.gmra.mrb[10].mxu1 %vm314_vm0, %v764_v10  ;;  %v2306_v9 = vpack.c.bf16 %v1569_v8, %v1568_v7  ;;  %v1570_v10 = vld [vmem:[%s2898_s5 + $0x40] sm:$0xff] }
 0x1a4   :  { %2087 = vmatprep.mubr.msk.f32.mxu0 %vm314_vm0, %v344_v11  ;;  %2110 = vmatprep.mubr.msk.f32.mxu1 %vm314_vm0, %v765_v12  ;;  %v1571_v11 = vld [vmem:[%s2898_s5 + $0x48] sm:$0xff] }
 0x1a5   :  { %2298 = vmatpush3.bf16.msra.mxu0 %v2297_v62  ;;  %v2309_v12 = vpack.c.bf16 %v1571_v11, %v1570_v10 }
 0x1a6   :  { %2299 = vmatprep.subr.bf16.mxu0 %v2449_v63 }
 0x1a7   :  { %2088 = vmatmul.mubr.msk.f32.gmra.mrb[28].mxu0 %vm314_vm0, %v345_v13  ;;  %2111 = vmatmul.mubr.msk.f32.gmra.mrb[12].mxu1 %vm314_vm0, %v766_v14  ;;  %v1572_v13 = vld [vmem:[%s2898_s5 + $0x50] sm:$0xff]  ;;  %v1573_v14 = vld [vmem:[%s2898_s5 + $0x58] sm:$0xff] }
 0x1a8   :  { %2090 = vmatprep.mubr.msk.f32.mxu0 %vm314_vm0, %v346_v15  ;;  %2113 = vmatprep.mubr.msk.f32.mxu1 %vm314_vm0, %v767_v16  ;;  %v2312_v15 = vpack.c.bf16 %v1573_v14, %v1572_v13  ;;  %v1574_v16 = vld [vmem:[%s2898_s5 + $0x60] sm:$0xff] }
 0x1a9   :  { %2301 = vmatpush3.bf16.msra.mxu0 %v2300_v2 }
 0x1aa   :  { %2302 = vmatprep.subr.bf16.mxu0 %v2449_v63 }
 0x1ab   :  { %2091 = vmatmul.mubr.msk.f32.gmra.mrb[30].mxu0 %vm314_vm0, %v347_v17  ;;  %2114 = vmatmul.mubr.msk.f32.gmra.mrb[14].mxu1 %vm314_vm0, %v768_v18  ;;  %v1575_v17 = vld [vmem:[%s2898_s5 + $0x68] sm:$0xff] }
 0x1ac   :  { %2116 = vmatprep.mubr.msk.f32.mxu1 %vm314_vm0, %v769_v19  ;;  %v2315_v18 = vpack.c.bf16 %v1575_v17, %v1574_v16  ;;  %v1576_v19 = vld [vmem:[%s2898_s5 + $0x70] sm:$0xff]  ;;  %2221 = vmatprep.mubr.msk.f32.mxu0 %vm2450_vm1, %v2448_v5 }
 0x1af   :  { %2117 = vmatmul.mubr.msk.f32.gmra.mrb[16].mxu1 %vm314_vm0, %v770_v20  ;;  %v1577_v20 = vld [vmem:[%s2898_s5 + $0x78] sm:$0xff] }
 0x1b0   :  { %2119 = vmatprep.mubr.msk.f32.mxu1 %vm314_vm0, %v771_v21  ;;  %v2318_v21 = vpack.c.bf16 %v1577_v20, %v1576_v19 }
 0x1b3   :  { %2120 = vmatmul.mubr.msk.f32.gmra.mrb[18].mxu1 %vm314_vm0, %v772_v22 }
 0x1b4   :  { %2122 = vmatprep.mubr.msk.f32.mxu1 %vm314_vm0, %v773_v23 }
 0x1b7   :  { %2123 = vmatmul.mubr.msk.f32.gmra.mrb[20].mxu1 %vm314_vm0, %v774_v24 }
 0x1b8   :  { %2133 = vmatprep.mubr.msk.f32.mxu1 %vm314_vm0, %v989_v27 }
 0x1bb   :  { %2134 = vmatmul.mubr.msk.f32.vlgmr.msra.gmra.mrb[6].mxu1 %vm314_vm0, %v990_v29 }
 0x1bc   :  { %2291 = vmatpush3.bf16.msra.mxu1 %v2288_v6  ;;  %2136 = vmatprep.mubr.msk.f32.mxu1 %vm314_vm0, %v991_v30  ;;  %v2303_v6 = vpack.c.bf16 %v1567_v4, %v1566_v3 }
 0x1bd   :  { %2293 = vmatprep.subr.bf16.mxu1 %v2292_v28 }
 0x1be   :  { %2304 = vmatpush3.bf16.msra.mxu0 %v2303_v6 }
 0x1bf   :  { %2137 = vmatmul.mubr.msk.f32.gmra.mrb[8].mxu1 %vm314_vm0, %v992_v31  ;;  %2305 = vmatprep.subr.bf16.mxu0 %v2449_v63 }
 0x1c0   :  { %2139 = vmatprep.mubr.msk.f32.mxu1 %vm314_vm0, %v993_v32  ;;  %2295 = vmatpush3.bf16.msra.mxu1 %v2292_v28 }
 0x1c2   :  { %2307 = vmatpush3.bf16.msra.mxu0 %v2306_v9 }
 0x1c3   :  { %2140 = vmatmul.mubr.msk.f32.gmra.mrb[10].mxu1 %vm314_vm0, %v994_v33  ;;  %2308 = vmatprep.subr.bf16.mxu0 %v2449_v63 }
 0x1c4   :  { %2142 = vmatprep.mubr.msk.f32.mxu1 %vm314_vm0, %v995_v34 }
 0x1c6   :  { %2310 = vmatpush3.bf16.msra.mxu0 %v2309_v12 }
 0x1c7   :  { %2143 = vmatmul.mubr.msk.f32.gmra.mrb[12].mxu1 %vm314_vm0, %v996_v35  ;;  %2311 = vmatprep.subr.bf16.mxu0 %v2449_v63 }
 0x1c8   :  { %2145 = vmatprep.mubr.msk.f32.mxu1 %vm314_vm0, %v997_v36 }
 0x1ca   :  { %2313 = vmatpush3.bf16.msra.mxu0 %v2312_v15 }
 0x1cb   :  { %2146 = vmatmul.mubr.msk.f32.gmra.mrb[14].mxu1 %vm314_vm0, %v998_v37  ;;  %2314 = vmatprep.subr.bf16.mxu0 %v2449_v63 }
 0x1cc   :  { %2148 = vmatprep.mubr.msk.f32.mxu1 %vm314_vm0, %v999_v38 }
 0x1ce   :  { %2316 = vmatpush3.bf16.msra.mxu0 %v2315_v18 }
 0x1cf   :  { %2149 = vmatmul.mubr.msk.f32.gmra.mrb[16].mxu1 %vm314_vm0, %v1000_v39  ;;  %2317 = vmatprep.subr.bf16.mxu0 %v2449_v63 }
 0x1d0   :  { %2151 = vmatprep.mubr.msk.f32.mxu1 %vm314_vm0, %v1001_v40 }
 0x1d2   :  { %2319 = vmatpush3.bf16.msra.mxu0 %v2318_v21 }
 0x1d3   :  { %2152 = vmatmul.mubr.msk.f32.gmra.mrb[18].mxu1 %vm314_vm0, %v1002_v41 }
 0x1d4   :  { %2154 = vmatprep.mubr.msk.f32.mxu1 %vm314_vm0, %v1003_v42 }
 0x1d7   :  { %2155 = vmatmul.mubr.msk.f32.gmra.mrb[20].mxu1 %vm314_vm0, %v1004_v43 }
 0x1d8   :  { %2165 = vmatprep.mubr.msk.f32.mxu1 %vm314_vm0, %v1219_v44 }
 0x1db   :  { %2166 = vmatmul.mubr.msk.f32.vlgmr.msra.gmra.mrb[6].mxu1 %vm314_vm0, %v1220_v45 }
 0x1dc   :  { %2168 = vmatprep.mubr.msk.f32.mxu1 %vm314_vm0, %v1221_v46 }
 0x1df   :  { %2169 = vmatmul.mubr.msk.f32.gmra.mrb[8].mxu1 %vm314_vm0, %v1222_v47 }
 0x1e0   :  { %2171 = vmatprep.mubr.msk.f32.mxu1 %vm314_vm0, %v1223_v48 }
 0x1e3   :  { %2172 = vmatmul.mubr.msk.f32.gmra.mrb[10].mxu1 %vm314_vm0, %v1224_v49 }
 0x1e4   :  { %2174 = vmatprep.mubr.msk.f32.mxu1 %vm314_vm0, %v1225_v50  ;;  %v2825_v50 = vld [vmem:[#allocation3] ss:$0 sm:$0xff] }
 0x1e7   :  { %2175 = vmatmul.mubr.msk.f32.gmra.mrb[12].mxu1 %vm314_vm0, %v1226_v51 }
 0x1e8   :  { %2177 = vmatprep.mubr.msk.f32.mxu1 %vm314_vm0, %v1227_v52 }
 0x1eb   :  { %2178 = vmatmul.mubr.msk.f32.gmra.mrb[14].mxu1 %vm314_vm0, %v1228_v53 }
 0x1ec   :  { %2180 = vmatprep.mubr.msk.f32.mxu1 %vm314_vm0, %v1229_v54 }
 0x1ef   :  { %2181 = vmatmul.mubr.msk.f32.gmra.mrb[16].mxu1 %vm314_vm0, %v1230_v55  ;;  %v2831_v55 = vld [vmem:[%s2897_s4 + $0x8] sm:$0xff] }
 0x1f0   :  { %2183 = vmatprep.mubr.msk.f32.mxu1 %vm314_vm0, %v1231_v56 }
 0x1f3   :  { %2184 = vmatmul.mubr.msk.f32.gmra.mrb[18].mxu1 %vm314_vm0, %v1232_v57 }
 0x1f4   :  { %2186 = vmatprep.mubr.msk.f32.mxu1 %vm314_vm0, %v1233_v58 }
 0x1f7   :  { %2187 = vmatmul.mubr.msk.f32.gmra.mrb[20].mxu1 %vm314_vm0, %v1234_v59  ;;  %v2837_v59 = vld [vmem:[%s2897_s4] sm:$0xff] }
 0x262   :  { %v2054_v22 = vpop.f32.mrb[0].mxu1  ;;  %v2071_v23 = vpop.f32.mrb[16].mxu0 }
 0x263   :  { %v537_v24 = vpop.f32.mrb[1].mxu1  ;;  %v680_v25 = vpop.f32.mrb[17].mxu0 }
 0x266   :  { %v2057_v26 = vpop.f32.mrb[2].mxu1  ;;  %v2074_v27 = vpop.f32.mrb[18].mxu0 }
 0x267   :  { %v547_v28 = vpop.f32.mrb[3].mxu1  ;;  %v690_v29 = vpop.f32.mrb[19].mxu0 }
 0x26a   :  { %v2060_v30 = vpop.f32.mrb[4].mxu1  ;;  %v2077_v31 = vpop.f32.mrb[20].mxu0 }
 0x26b   :  { %v557_v32 = vpop.f32.mrb[5].mxu1  ;;  %v700_v33 = vpop.f32.mrb[21].mxu0 }
 0x26e   :  { %v2080_v34 = vpop.f32.mrb[22].mxu0 }
 0x26f   :  { %v710_v35 = vpop.f32.mrb[23].mxu0 }
 0x272   :  { %v2083_v36 = vpop.f32.mrb[24].mxu0 }
 0x273   :  { %v2811_v5 = vpop.f32.mrb[25].mxu0 }
 0x276   :  { %v2086_v37 = vpop.f32.mrb[26].mxu0 }
 0x277   :  { %v2813_v38 = vadd.f32 %v2086_v37, %v2054_v22  ;;  %v730_v39 = vpop.f32.mrb[27].mxu0 }
 0x278   :  { %v2815_v40 = vadd.f32 %v730_v39, %v537_v24 }
 0x27a   :  { %v2089_v41 = vpop.f32.mrb[28].mxu0 }
 0x27b   :  { %v2817_v42 = vadd.f32 %v2089_v41, %v2057_v26  ;;  %v740_v43 = vpop.f32.mrb[29].mxu0 }
 0x27c   :  { %v2819_v44 = vadd.f32 %v740_v43, %v547_v28 }
 0x27e   :  { %v2092_v45 = vpop.f32.mrb[30].mxu0 }
 0x27f   :  { %v2821_v46 = vadd.f32 %v2092_v45, %v2060_v30  ;;  %v750_v47 = vpop.f32.mrb[31].mxu0 }
 0x280   :  { %v2823_v48 = vadd.f32 %v750_v47, %v557_v32 }
 0x2ae   :  { %v2167_v49 = vpop.f32.mrb[6].mxu1 }
 0x2af   :  { %v2324_v51 = vadd.f32 %v2167_v49, %v2071_v23  ;;  %v1354_v52 = vpop.f32.mrb[7].mxu1 }
 0x2b0   :  { %v2325_v53 = vadd.f32 %v1354_v52, %v680_v25 }
 0x2b1   :  { %v1457_v54 = vadd.f32 %v2324_v51, %v2825_v50 }
 0x2b2   :  { %v1456_v56 = vadd.f32 %v2325_v53, %v2825_v50  ;;  %v2170_v57 = vpop.f32.mrb[8].mxu1 }
 0x2b3   :  { %v1473_v58 = vmax.f32 %v1457_v54, 0.0  ;;  %v2326_v60 = vadd.f32 %v2170_v57, %v2074_v27  ;;  %v1364_v61 = vpop.f32.mrb[9].mxu1 }
 0x2b4   :  { %v1472_v62 = vmax.f32 %v1456_v56, 0.0  ;;  %v2327_v63 = vadd.f32 %v1364_v61, %v690_v29 }
 0x2b5   :  { %v1491_v0 = vmul.f32 %v2831_v55, %v1473_v58  ;;  %v1459_v1 = vadd.f32 %v2326_v60, %v2825_v50 }
 0x2b6   :  { %v1490_v2 = vmul.f32 %v2837_v59, %v1472_v62  ;;  %v1458_v3 = vadd.f32 %v2327_v63, %v2825_v50  ;;  %v2173_v4 = vpop.f32.mrb[10].mxu1 }
 0x2b7   :  { %v1475_v6 = vmax.f32 %v1459_v1, 0.0  ;;  %v2328_v7 = vadd.f32 %v2173_v4, %v2077_v31  ;;  %v1374_v8 = vpop.f32.mrb[11].mxu1 }
 0x2b8   :  { %v1506_v9 = vmax.f32 %v1490_v2, %v1491_v0  ;;  %v1474_v10 = vmax.f32 %v1458_v3, 0.0  ;;  %v2329_v11 = vadd.f32 %v1374_v8, %v700_v33 }
 0x2b9   :  { %v1493_v12 = vmul.f32 %v2831_v55, %v1475_v6  ;;  %v1461_v13 = vadd.f32 %v2328_v7, %v2825_v50 }
 0x2ba   :  { %v1507_v14 = vrot.slane %v1506_v9, 4  ;;  %v1492_v15 = vmul.f32 %v2837_v59, %v1474_v10  ;;  %v1460_v16 = vadd.f32 %v2329_v11, %v2825_v50  ;;  %v2176_v17 = vpop.f32.mrb[12].mxu1 }
 0x2bb   :  { %v1477_v18 = vmax.f32 %v1461_v13, 0.0  ;;  %v2330_v19 = vadd.f32 %v2176_v17, %v2080_v34  ;;  %v1384_v20 = vpop.f32.mrb[13].mxu1 }
 0x2bc   :  { %v1508_v21 = vmax.f32 %v1506_v9, %v1507_v14  ;;  %v1513_v22 = vmax.f32 %v1492_v15, %v1493_v12  ;;  %v1476_v23 = vmax.f32 %v1460_v16, 0.0  ;;  %v2331_v24 = vadd.f32 %v1384_v20, %v710_v35 }
 0x2bd   :  { %v1495_v25 = vmul.f32 %v2831_v55, %v1477_v18  ;;  %v1463_v26 = vadd.f32 %v2330_v19, %v2825_v50 }
 0x2be   :  { %v1509_v27 = vrot.slane %v1508_v21, 2  ;;  %v1514_v28 = vrot.slane %v1513_v22, 4  ;;  %v1494_v29 = vmul.f32 %v2837_v59, %v1476_v23  ;;  %v1462_v30 = vadd.f32 %v2331_v24, %v2825_v50  ;;  %v2179_v31 = vpop.f32.mrb[14].mxu1 }
 0x2bf   :  { %v1479_v32 = vmax.f32 %v1463_v26, 0.0  ;;  %v2332_v33 = vadd.f32 %v2179_v31, %v2083_v36  ;;  %v1394_v37 = vpop.f32.mrb[15].mxu1 }
 0x2c0   :  { %v1510_v34 = vmax.f32 %v1508_v21, %v1509_v27  ;;  %v1515_v39 = vmax.f32 %v1513_v22, %v1514_v28  ;;  %v1520_v41 = vmax.f32 %v1494_v29, %v1495_v25  ;;  %v1478_v43 = vmax.f32 %v1462_v30, 0.0 }
 0x2c1   :  { %v1497_v35 = vmul.f32 %v2831_v55, %v1479_v32  ;;  %v1465_v45 = vadd.f32 %v2332_v33, %v2825_v50  ;;  %v2333_v47 = vadd.f32 %v1394_v37, %v2811_v5 }
 0x2c2   :  { %v1511_v49 = vrot.slane %v1510_v34, 1  ;;  %v1516_v51 = vrot.slane %v1515_v39, 2  ;;  %v1521_v52 = vrot.slane %v1520_v41, 4  ;;  %v1496_v53 = vmul.f32 %v2837_v59, %v1478_v43  ;;  %v2182_v54 = vpop.f32.mrb[16].mxu1 }
 0x2c3   :  { %v1481_v56 = vmax.f32 %v1465_v45, 0.0  ;;  %v1464_v36 = vadd.f32 %v2333_v47, %v2825_v50  ;;  %v2335_v57 = vadd.f32 %v2182_v54, %v2813_v38  ;;  %v1404_v58 = vpop.f32.mrb[17].mxu1 }
 0x2c4   :  { %v1517_v60 = vmax.f32 %v1515_v39, %v1516_v51  ;;  %v1522_v61 = vmax.f32 %v1520_v41, %v1521_v52  ;;  %v1527_v62 = vmax.f32 %v1496_v53, %v1497_v35  ;;  %v2337_v1 = vadd.f32 %v1404_v58, %v2815_v40 }
 0x2c5   :  { %v1499_v63 = vmul.f32 %v2831_v55, %v1481_v56  ;;  %v1480_v5 = vmax.f32 %v1464_v36, 0.0  ;;  %v1467_v0 = vadd.f32 %v2335_v57, %v2825_v50  ;;  %v1512_v2 = vmax.f32 %v1510_v34, %v1511_v49 }
 0x2c6   :  { %v1518_v3 = vrot.slane %v1517_v60, 1  ;;  %v1523_v4 = vrot.slane %v1522_v61, 2  ;;  %v1528_v6 = vrot.slane %v1527_v62, 4  ;;  %v2185_v7 = vpop.f32.mrb[18].mxu1  ;;  %v1466_v9 = vadd.f32 %v2337_v1, %v2825_v50 }
 0x2c7   :  { %v1498_v8 = vmul.f32 %v2837_v59, %v1480_v5  ;;  %v1483_v38 = vmax.f32 %v1467_v0, 0.0  ;;  %v2339_v10 = vadd.f32 %v2185_v7, %v2817_v42  ;;  %v1414_v11 = vpop.f32.mrb[19].mxu1 }
 0x2c8   :  { %v1519_v12 = vmax.f32 %v1517_v60, %v1518_v3  ;;  %v1524_v13 = vmax.f32 %v1522_v61, %v1523_v4  ;;  %v1529_v14 = vmax.f32 %v1527_v62, %v1528_v6  ;;  %v2341_v15 = vadd.f32 %v1414_v11, %v2819_v44 }
 0x2c9   :  { %v1534_v16 = vmax.f32 %v1498_v8, %v1499_v63  ;;  %v1501_v40 = vmul.f32 %v2831_v55, %v1483_v38  ;;  %v1482_v17 = vmax.f32 %v1466_v9, 0.0  ;;  %v1469_v18 = vadd.f32 %v2339_v10, %v2825_v50 }
 0x2ca   :  { %v1594_v19 = vsel %vm1593_vm2, %v1519_v12, %v1512_v2  ;;  %v1525_v20 = vrot.slane %v1524_v13, 1  ;;  %v1530_v21 = vrot.slane %v1529_v14, 2  ;;  %v1468_v22 = vadd.f32 %v2341_v15, %v2825_v50  ;;  %v2188_v23 = vpop.f32.mrb[20].mxu1  ;;  %v1823_v12 = vld [vmem:[%s2899_s6] ss:$0 sm:$0xff] }
 0x2cb   :  { %v1535_v42 = vrot.slane %v1534_v16, 4  ;;  %v1500_v24 = vmul.f32 %v2837_v59, %v1482_v17  ;;  %v1485_v25 = vmax.f32 %v1469_v18, 0.0  ;;  %v2343_v26 = vadd.f32 %v2188_v23, %v2821_v46  ;;  %v1424_v44 = vpop.f32.mrb[21].mxu1 }
 0x2cc   :  { %v1526_v27 = vmax.f32 %v1524_v13, %v1525_v20  ;;  %v1531_v28 = vmax.f32 %v1529_v14, %v1530_v21  ;;  %v1484_v29 = vmax.f32 %v1468_v22, 0.0  ;;  %v2345_v30 = vadd.f32 %v1424_v44, %v2823_v48 }
 0x2cd   :  { %v1536_v31 = vmax.f32 %v1534_v16, %v1535_v42  ;;  %v1541_v32 = vmax.f32 %v1500_v24, %v1501_v40  ;;  %v1503_v33 = vmul.f32 %v2831_v55, %v1485_v25  ;;  %v1471_v37 = vadd.f32 %v2343_v26, %v2825_v50 }
 0x2ce   :  { %v1532_v34 = vrot.slane %v1531_v28, 1  ;;  %v1502_v39 = vmul.f32 %v2837_v59, %v1484_v29  ;;  %v1470_v41 = vadd.f32 %v2345_v30, %v2825_v50  ;;  %v1596_v43 = vsel %vm1595_vm3, %v1526_v27, %v1594_v19 }
 0x2cf   :  { %v1537_v46 = vrot.slane %v1536_v31, 2  ;;  %v1542_v35 = vrot.slane %v1541_v32, 4  ;;  %v1487_v45 = vmax.f32 %v1471_v37, 0.0 }
 0x2d0   :  { %v1533_v47 = vmax.f32 %v1531_v28, %v1532_v34  ;;  %v1548_v49 = vmax.f32 %v1502_v39, %v1503_v33  ;;  %v1486_v48 = vmax.f32 %v1470_v41, 0.0 }
 0x2d1   :  { %v1538_v51 = vmax.f32 %v1536_v31, %v1537_v46  ;;  %v1543_v52 = vmax.f32 %v1541_v32, %v1542_v35  ;;  %v1505_v53 = vmul.f32 %v2831_v55, %v1487_v45 }
 0x2d2   :  { %v1549_v54 = vrot.slane %v1548_v49, 4  ;;  %v1504_v56 = vmul.f32 %v2837_v59, %v1486_v48  ;;  %v1598_v36 = vsel %vm1597_vm4, %v1533_v47, %v1596_v43 }
 0x2d3   :  { %v1539_v57 = vrot.slane %v1538_v51, 1  ;;  %v1544_v58 = vrot.slane %v1543_v52, 2 }
 0x2d4   :  { %v1550_v50 = vmax.f32 %v1548_v49, %v1549_v54  ;;  %v1555_v60 = vmax.f32 %v1504_v56, %v1505_v53 }
 0x2d5   :  { %v1540_v61 = vmax.f32 %v1538_v51, %v1539_v57  ;;  %v1545_v62 = vmax.f32 %v1543_v52, %v1544_v58 }
 0x2d6   :  { %v1551_v63 = vrot.slane %v1550_v50, 2  ;;  %v1556_v5 = vrot.slane %v1555_v60, 4 }
 0x2d7   :  { %v1546_v0 = vrot.slane %v1545_v62, 1  ;;  %v1600_v1 = vsel %vm1599_vm5, %v1540_v61, %v1598_v36 }
 0x2d8   :  { %v1552_v2 = vmax.f32 %v1550_v50, %v1551_v63  ;;  %v1557_v3 = vmax.f32 %v1555_v60, %v1556_v5 }
 0x2d9   :  { %v1547_v4 = vmax.f32 %v1545_v62, %v1546_v0 }
 0x2da   :  { %v1553_v55 = vrot.slane %v1552_v2, 1  ;;  %v1558_v6 = vrot.slane %v1557_v3, 2 }
 0x2db   :  { %v1602_v7 = vsel %vm1601_vm6, %v1547_v4, %v1600_v1 }
 0x2dc   :  { %v1559_v59 = vmax.f32 %v1557_v3, %v1558_v6  ;;  %v1554_v8 = vmax.f32 %v1552_v2, %v1553_v55 }
 0x2de   :  { %v1560_v38 = vrot.slane %v1559_v59, 1  ;;  %v1604_v9 = vsel %vm1603_vm7, %v1554_v8, %v1602_v7 }
 0x2e0   :  { %v1561_v10 = vmax.f32 %v1559_v59, %v1560_v38 }
 0x2e2   :  { %v1606_v11 = vsel %vm1605_vm8, %v1561_v10, %v1604_v9 }
 0x2e3   :  { %2222 = vmatmul.mubr.f32.vlgmr.msra.gmra.mrb[32].mxu0 %v1606_v11 }
 0x3b6   :  { %v1674_v13 = vpop.f32.mrb[32].mxu0 }
 0x3b7   :  { %v1675_v14 = vadd.f32 %v1823_v12, %v1674_v13  ;;  %v2223_v15 = vpop.f32.mrb[33].mxu0 }
 0x3b9   :  { %1678 = vst [vmem:[#allocation6] sm:$0xff] %v1675_v14 }
 0x3ba   :  { %2430 = shalt.err (!%p2427_p12)
}
 0x3bb   :  { %s2431_s1 = scalar_lea.hbm %s2900_s7, 128 }
 0x3bc   :  { %p2432_p13 = scmp.ne.s32.totalorder %s2900_s7, %s2431_s1  ;;  %p2435_p0 = scmp.lt.u32.totalorder %s2431_s1, %s2900_s7 }
 0x3be   :  { %p2437_p1 = pnand %p2435_p0, %p2432_p13 }
 0x3c0   :  { %2440 = shalt.err (!%p2437_p1)
}
 0x3c1   :  { %1688 = dma.vmem_to_hbm [thread:$0]  %s1686_s26, 128, %s2900_s7, [#allocation5]  }
 0x3c2   :  { %2443 = dma.done.wait [#allocation5], 128  }
 0x3c3   :  { %2444 = vsyncadd [#allocation5], 4294967168 }
 0x3c4   :  { %1692 = vsyncpa [#allocation4], 1 }
 0x3c5   :  { %1693 = vsyncpa [#allocation5], 1 }

</bundles_post_ra>
